<compile_context>
chip_gen: v7x
topology: tpu7x:2x2x1
jax: 0.10.0
libtpu: 0.0.40
codegen_flags: <defaults>
</compile_context>

<pallas_src>
import functools

import jax
import jax.numpy as jnp
from jax import lax
from jax.experimental import pallas as pl
from jax.experimental.pallas import tpu as pltpu


_LANE = 128
_VMEM_LIMIT_BYTES = 48 * 1024 * 1024      # <= v7x 64 MiB physical, headroom left
_B_RESIDENT_MAX_BYTES = 8 * 1024 * 1024   # per-buffer cap for VMEM-resident B


# ---------------------------------------------------------------------------
# small helpers
# ---------------------------------------------------------------------------
def _round_up(x: int, m: int) -> int:
    return (x + m - 1) // m * m


def _pick_tile(dim: int, cap: int) -> int:
    """Largest 128-multiple divisor of `dim` that is <= cap (dim is a 128-mult)."""
    if dim <= cap:
        return dim
    t = (cap // _LANE) * _LANE
    while t >= _LANE:
        if dim % t == 0:
            return t
        t -= _LANE
    return dim


def _agg_row_tile(n_pad: int, cap: int = 512) -> int:
    """Row tile for the O(N^2) aggregation.

    Prefer large tiles (amortize the ~0.35us per-grid-step overhead) but keep
    >= 2 row tiles so v7x's two TensorCores both get work on the 'parallel'
    row axis (moot on v5e/v6e's single TC).
    """
    tm = _pick_tile(n_pad, cap)
    if n_pad // tm < 2 and n_pad > _LANE:
        tm = _pick_tile(n_pad, max(_LANE, n_pad // 2))
    return tm


# ---------------------------------------------------------------------------
# Pallas kernel: tiled  C = act(A @ B + bias)  with f32 accumulation
# ---------------------------------------------------------------------------
def _matmul_bias_act_kernel(a_ref, b_ref, bias_ref, o_ref, acc_ref,
                            *, apply_relu: bool, b_resident_tk):
    k = pl.program_id(2)

    @pl.when(k == 0)
    def _():
        acc_ref[...] = jnp.zeros_like(acc_ref)

    if b_resident_tk is None:
        # B block is (tk, tn), indexed (kk, j) by the BlockSpec.
        b_blk = b_ref[...]
    else:
        # B block is the full (K, tn) strip, VMEM-resident; slice this K step.
        kstart = pl.multiple_of(k * b_resident_tk, b_resident_tk)
        b_blk = b_ref[pl.ds(kstart, b_resident_tk), :]

    acc_ref[...] += jnp.dot(a_ref[...], b_blk,
                            preferred_element_type=jnp.float32)

    @pl.when(k == pl.num_programs(2) - 1)
    def _():
        h = acc_ref[...] + bias_ref[...].astype(jnp.float32)
        if apply_relu:
            h = jnp.maximum(h, 0.0)
        o_ref[...] = h.astype(o_ref.dtype)


def pallas_matmul_bias_act(a, b, bias, *, apply_relu: bool, out_dtype,
                           tm=None, tn=None, tk=None, b_resident=None):
    """C = act(a @ b + bias); a:(M,K), b:(K,N), bias:(1,N). Dims 128-padded."""
    m, k = a.shape
    k2, n = b.shape
    assert k == k2 and bias.shape == (1, n)
    tm = tm or _pick_tile(m, 512)
    tn = tn or _pick_tile(n, 512)
    tk = tk or _pick_tile(k, 512)
    grid = (m // tm, n // tn, k // tk)
    grid_m, grid_n, grid_k = grid

    if b_resident is None:
        # Resident B only pays off when the j axis collapses to one tile (B is
        # then DMAed exactly once instead of once per row tile) and it fits a
        # VMEM buffer comfortably on every chip generation.
        b_resident = (grid_n == 1 and grid_k > 1
                      and k * n * b.dtype.itemsize <= _B_RESIDENT_MAX_BYTES)

    if b_resident:
        b_spec = pl.BlockSpec((k, tn), lambda i, j, kk: (0, j))
        b_resident_tk = tk
        b_bytes = k * n * b.dtype.itemsize              # streamed exactly once
    else:
        b_spec = pl.BlockSpec((tk, tn), lambda i, j, kk: (kk, j))
        b_resident_tk = None
        b_bytes = grid_m * k * n * b.dtype.itemsize     # re-streamed per row tile

    kernel = functools.partial(_matmul_bias_act_kernel, apply_relu=apply_relu,
                               b_resident_tk=b_resident_tk)
    bytes_accessed = (grid_n * m * k * a.dtype.itemsize        # A re-read per j
                      + b_bytes
                      + grid_m * n * bias.dtype.itemsize
                      + m * n * jnp.dtype(out_dtype).itemsize)

    return pl.pallas_call(
        kernel,
        out_shape=jax.ShapeDtypeStruct((m, n), out_dtype),
        grid=grid,
        in_specs=[
            pl.BlockSpec((tm, tk), lambda i, j, kk: (i, kk)),
            b_spec,
            pl.BlockSpec((1, tn), lambda i, j, kk: (0, j)),
        ],
        out_specs=pl.BlockSpec((tm, tn), lambda i, j, kk: (i, j)),
        scratch_shapes=[pltpu.VMEM((tm, tn), jnp.float32)],
        compiler_params=pltpu.CompilerParams(
            dimension_semantics=("parallel", "parallel", "arbitrary"),
            vmem_limit_bytes=_VMEM_LIMIT_BYTES),
        cost_estimate=pl.CostEstimate(flops=2 * m * n * k, transcendentals=0,
                                      bytes_accessed=bytes_accessed),
    )(a, b, bias)


# ---------------------------------------------------------------------------
# Glue: gcn_norm-densified adjacency (PyG GCNConv defaults:
# add_self_loops=True, normalize=True, D^-1/2 (A+I) D^-1/2).
# Single scatter into the (already padded) buffer + single cast.
# ---------------------------------------------------------------------------
def build_normalized_adjacency(edge_index, edge_weight, num_nodes,
                               n_pad=None, out_dtype=jnp.float32):
    if n_pad is None:
        n_pad = num_nodes
    src = edge_index[0]
    dst = edge_index[1]
    if edge_weight is None:
        edge_weight = jnp.ones(src.shape[0], dtype=jnp.float32)
    loop = jnp.arange(num_nodes, dtype=src.dtype)
    src = jnp.concatenate([src, loop])
    dst = jnp.concatenate([dst, loop])
    ew = jnp.concatenate([edge_weight.astype(jnp.float32),
                          jnp.ones(num_nodes, dtype=jnp.float32)])
    deg = jnp.zeros(num_nodes, dtype=jnp.float32).at[dst].add(ew)
    deg_inv_sqrt = jnp.where(deg > 0, 1.0 / jnp.sqrt(deg), 0.0)
    norm = deg_inv_sqrt[src] * ew * deg_inv_sqrt[dst]
    # out[i] = sum_j A_hat[i, j] * (x_j W)   (messages src -> dst)
    a_hat = (jnp.zeros((n_pad, n_pad), dtype=jnp.float32)
             .at[dst, src].add(norm))
    return a_hat.astype(out_dtype)


# ---------------------------------------------------------------------------
# SimpleGNN parameters + forward
# ---------------------------------------------------------------------------
def init_simple_gnn_params(key, input_dim, hidden_dim, output_dim, num_layers=2):
    dims = [input_dim] + [hidden_dim] * (num_layers - 1) + [output_dim]
    params = []
    for i in range(num_layers):
        key, kw = jax.random.split(key)
        f_in, f_out = dims[i], dims[i + 1]
        scale = jnp.sqrt(6.0 / (f_in + f_out))
        w = jax.random.uniform(kw, (f_in, f_out), jnp.float32, -scale, scale)
        b = jnp.zeros((1, f_out), dtype=jnp.float32)
        params.append((w, b))
    return params


def simple_gnn_forward(params, x, edge_index, edge_attr=None, *,
                       node_pad=256, a_hat_pad=None):
    """Forward pass matching SimpleGNN.forward (inference semantics)."""
    n, f_in = x.shape
    f_out_final = params[-1][0].shape[1]
    n_pad = _round_up(max(n, _LANE), node_pad)

    if a_hat_pad is None:
        # TODO(synk): for a static graph, precompute this once outside the
        # per-call path and pass it via a_hat_pad so the Pallas kernels are
        # the only O(N^2) work per forward.
        a_hat_pad = build_normalized_adjacency(
            edge_index, edge_attr, n, n_pad=n_pad, out_dtype=jnp.bfloat16)

    fp_in = _round_up(f_in, _LANE)
    h = jnp.zeros((n_pad, fp_in), jnp.bfloat16).at[:n, :f_in].set(
        x.astype(jnp.bfloat16))

    # Aggregation tiling (shared across layers): big K tile, >=2 row tiles.
    tm_agg = _agg_row_tile(n_pad)
    tk_agg = _pick_tile(n_pad, 2048)

    num_layers = len(params)
    for i, (w, b) in enumerate(params):
        f_i, f_o = w.shape
        fp_i, fp_o = _round_up(f_i, _LANE), _round_up(f_o, _LANE)
        w_bf = jnp.zeros((fp_i, fp_o), jnp.bfloat16).at[:f_i, :f_o].set(
            w.astype(jnp.bfloat16))
        b_pad = jnp.zeros((1, fp_o), jnp.float32).at[:, :f_o].set(b)

        is_last = i == num_layers - 1
        apply_relu = not is_last
        # Hidden activations come out of the fused epilogue directly as bf16
        # (next layer's matmul operand); final layer stays f32.
        out_dtype = jnp.float32 if is_last else jnp.bfloat16

        if fp_i <= fp_o:
            # Project first (narrower aggregation width): H = A_hat @ (X W) + b
            xw = pallas_matmul_bias_act(
                h, w_bf, jnp.zeros((1, fp_o), jnp.float32),
                apply_relu=False, out_dtype=jnp.bfloat16)
            h = pallas_matmul_bias_act(
                a_hat_pad, xw, b_pad, apply_relu=apply_relu,
                out_dtype=out_dtype,
                tm=tm_agg, tn=_pick_tile(fp_o, 512), tk=tk_agg)
        else:
            # Aggregate first on the narrower input width: H = (A_hat @ X) W + b
            ax = pallas_matmul_bias_act(
                a_hat_pad, h, jnp.zeros((1, fp_i), jnp.float32),
                apply_relu=False, out_dtype=jnp.bfloat16,
                tm=tm_agg, tn=_pick_tile(fp_i, 512), tk=tk_agg)
            h = pallas_matmul_bias_act(
                ax, w_bf, b_pad, apply_relu=apply_relu, out_dtype=out_dtype)
        # TODO(synk): F.dropout(p=0.1, training=self.training) omitted --
        # identity at inference; a stochastic mask has no deterministic ref.

    return h[:n, :f_out_final]


# ---------------------------------------------------------------------------
# References
# ---------------------------------------------------------------------------
def simple_gnn_reference_bf16(params, x, edge_index, edge_attr=None):
    """Precision-matched reference (bf16 operands, f32 acc, same assoc order)."""
    n = x.shape[0]
    a = build_normalized_adjacency(edge_index, edge_attr, n,
                                   out_dtype=jnp.bfloat16)
    h = x.astype(jnp.bfloat16)
    num_layers = len(params)
    for i, (w, b) in enumerate(params):
        f_i, f_o = w.shape
        fp_i, fp_o = _round_up(f_i, _LANE), _round_up(f_o, _LANE)
        w_bf = w.astype(jnp.bfloat16)
        if fp_i <= fp_o:
            xw = jnp.dot(h, w_bf,
                         preferred_element_type=jnp.float32).astype(jnp.bfloat16)
            out = jnp.dot(a, xw, preferred_element_type=jnp.float32) + b
        else:
            ax = jnp.dot(a, h,
                         preferred_element_type=jnp.float32).astype(jnp.bfloat16)
            out = jnp.dot(ax, w_bf, preferred_element_type=jnp.float32) + b
        if i < num_layers - 1:
            out = jnp.maximum(out, 0.0)
            h = out.astype(jnp.bfloat16)
        else:
            h = out
    return h


def simple_gnn_reference_f32(params, x, edge_index, edge_attr=None):
    """Full-precision reference (matches the PyTorch module numerically)."""
    n = x.shape[0]
    a = build_normalized_adjacency(edge_index, edge_attr, n)
    h = x.astype(jnp.float32)
    num_layers = len(params)
    for i, (w, b) in enumerate(params):
        h = jnp.dot(a, jnp.dot(h, w, precision=lax.Precision.HIGHEST),
                    precision=lax.Precision.HIGHEST) + b
        if i < num_layers - 1:
            h = jnp.maximum(h, 0.0)
    return h


# ---------------------------------------------------------------------------
if __name__ == "__main__":
    key = jax.random.PRNGKey(0)
    k_a, k_b, k_bias, k_x, k_src, k_dst, k_ew, k_p = jax.random.split(key, 8)

    # --- unit check of the fused kernel: multi-K accumulation + resident B ---
    a_t = jax.random.normal(k_a, (256, 512), jnp.float32).astype(jnp.bfloat16)
    b_t = jax.random.normal(k_b, (512, 128), jnp.float32).astype(jnp.bfloat16)
    bias_t = jax.random.normal(k_bias, (1, 128), jnp.float32)
    got = pallas_matmul_bias_act(a_t, b_t, bias_t, apply_relu=True,
                                 out_dtype=jnp.float32, tm=128, tn=128, tk=128)
    got = jax.block_until_ready(got)
    want = jnp.maximum(
        jnp.dot(a_t, b_t, preferred_element_type=jnp.float32) + bias_t, 0.0)
    assert jnp.allclose(got, want, atol=1e-2, rtol=1e-2), (
        float(jnp.max(jnp.abs(got - want))))

    # --- small synthetic graph (exercises both association orders) ---
    num_nodes = 16
    num_edges = 40
    input_dim, hidden_dim, output_dim, num_layers = 160, 32, 4, 3

    x = jax.random.normal(k_x, (num_nodes, input_dim), dtype=jnp.float32)
    src = jax.random.randint(k_src, (num_edges,), 0, num_nodes, dtype=jnp.int32)
    dst = jax.random.randint(k_dst, (num_edges,), 0, num_nodes, dtype=jnp.int32)
    edge_index = jnp.stack([src, dst], axis=0)
    edge_attr = jax.random.uniform(k_ew, (num_edges,), jnp.float32, 0.5, 1.5)

    params = init_simple_gnn_params(k_p, input_dim, hidden_dim, output_dim,
                                    num_layers)

    fwd = jax.jit(simple_gnn_forward)
    out = fwd(params, x, edge_index, edge_attr)
    out = jax.block_until_ready(out)

    assert out.shape == (num_nodes, output_dim)

    ref_bf16 = simple_gnn_reference_bf16(params, x, edge_index, edge_attr)
    ref_f32 = simple_gnn_reference_f32(params, x, edge_index, edge_attr)
    # tight check vs the precision-matched (bf16 operand / f32 accumulate) ref
    assert jnp.allclose(out, ref_bf16, atol=2e-3, rtol=2e-3), (
        float(jnp.max(jnp.abs(out - ref_bf16))))
    # loose check vs the full-f32 reference (bf16 rounding ~0.4% rel.)
    assert jnp.allclose(out, ref_f32, atol=5e-2, rtol=5e-2), (
        float(jnp.max(jnp.abs(out - ref_f32))))

    print("KERNEL_OK")
</pallas_src>

<mosaic_0001>
module attributes {stable_mosaic.version = 11 : i64} {
  func.func @_matmul_bias_act_kernel(%arg0: i32, %arg1: i32, %arg2: i32, %arg3: memref<128x128xbf16, #tpu.memory_space<vmem>>, %arg4: memref<512x128xbf16, #tpu.memory_space<vmem>>, %arg5: memref<1x128xf32, #tpu.memory_space<vmem>>, %arg6: memref<128x128xf32, #tpu.memory_space<vmem>>, %arg7: memref<128x128xf32, #tpu.memory_space<vmem>>) attributes {dimension_semantics = [#tpu.dimension_semantics<parallel>, #tpu.dimension_semantics<parallel>, #tpu.dimension_semantics<arbitrary>], iteration_bounds = array<i64: 2, 1, 4>, scalar_prefetch = 0 : i64, scratch_operands = 1 : i64, tpu.core_type = #tpu.core_type<tc>, window_params = [{transform_indices = @transform_0, window_bounds = array<i64: 128, 128>}, {transform_indices = @transform_1, window_bounds = array<i64: 512, 128>}, {transform_indices = @transform_2, window_bounds = array<i64: 1, 128>}, {transform_indices = @transform_3, window_bounds = array<i64: 128, 128>}]} {
    %c0_i32 = arith.constant 0 : i32
    %0 = arith.cmpi eq, %arg2, %c0_i32 : i32
    %1 = arith.extui %0 : i1 to i32
    %c0_i32_0 = arith.constant 0 : i32
    %2 = arith.cmpi ne, %1, %c0_i32_0 : i32
    scf.if %2 {
      %cst_8 = arith.constant 0.000000e+00 : f32
      %15 = vector.broadcast %cst_8 : f32 to vector<128x128xf32>
      %c0_9 = arith.constant 0 : index
      %c0_10 = arith.constant 0 : index
      %16 = vector.load %arg7[%c0_9, %c0_10] : memref<128x128xf32, #tpu.memory_space<vmem>>, vector<128x128xf32>
      tpu.vector_store %arg7[%c0_9, %c0_10], %15 {strides = array<i32>} : memref<128x128xf32, #tpu.memory_space<vmem>>, vector<128x128xf32>,
    } else {
    }
    %c128_i32 = arith.constant 128 : i32
    %3 = arith.muli %arg2, %c128_i32 : i32
    %4 = tpu.assume_multiple %3, 128 : i32
    %5 = arith.index_cast %4 : i32 to index
    %c0 = arith.constant 0 : index
    %6 = vector.load %arg4[%5, %c0] : memref<512x128xbf16, #tpu.memory_space<vmem>>, vector<128x128xbf16>
    %c0_1 = arith.constant 0 : index
    %c0_2 = arith.constant 0 : index
    %7 = vector.load %arg7[%c0_1, %c0_2] : memref<128x128xf32, #tpu.memory_space<vmem>>, vector<128x128xf32>
    %c0_3 = arith.constant 0 : index
    %c0_4 = arith.constant 0 : index
    %8 = vector.load %arg3[%c0_3, %c0_4] : memref<128x128xbf16, #tpu.memory_space<vmem>>, vector<128x128xbf16>
    %cst = arith.constant dense<0.000000e+00> : vector<128x128xf32>
    %9 = tpu.matmul %8, %6, %cst {dimension_numbers = #tpu.dot_dimension_numbers<[1], [0], [0], [1], [0, 0, 1, 1], [], []>} : vector<128x128xbf16>, vector<128x128xbf16>, vector<128x128xf32> -> vector<128x128xf32>
    %10 = arith.addf %7, %9 : vector<128x128xf32>
    %c0_5 = arith.constant 0 : index
    %c0_6 = arith.constant 0 : index
    %11 = vector.load %arg7[%c0_5, %c0_6] : memref<128x128xf32, #tpu.memory_space<vmem>>, vector<128x128xf32>
    tpu.vector_store %arg7[%c0_5, %c0_6], %10 {strides = array<i32>} : memref<128x128xf32, #tpu.memory_space<vmem>>, vector<128x128xf32>,
    %c3_i32 = arith.constant 3 : i32
    %12 = arith.cmpi eq, %arg2, %c3_i32 : i32
    %13 = arith.extui %12 : i1 to i32
    %c0_i32_7 = arith.constant 0 : i32
    %14 = arith.cmpi ne, %13, %c0_i32_7 : i32
    scf.if %14 {
      %c0_8 = arith.constant 0 : index
      %c0_9 = arith.constant 0 : index
      %15 = vector.load %arg7[%c0_8, %c0_9] : memref<128x128xf32, #tpu.memory_space<vmem>>, vector<128x128xf32>
      %c0_10 = arith.constant 0 : index
      %c0_11 = arith.constant 0 : index
      %16 = vector.load %arg5[%c0_10, %c0_11] : memref<1x128xf32, #tpu.memory_space<vmem>>, vector<1x128xf32>
      %17 = vector.broadcast %16 : vector<1x128xf32> to vector<128x128xf32>
      %18 = arith.addf %15, %17 : vector<128x128xf32>
      %cst_12 = arith.constant 0.000000e+00 : f32
      %19 = vector.broadcast %cst_12 : f32 to vector<128x128xf32>
      %20 = arith.maximumf %18, %19 : vector<128x128xf32>
      %c0_13 = arith.constant 0 : index
      %c0_14 = arith.constant 0 : index
      %21 = vector.load %arg6[%c0_13, %c0_14] : memref<128x128xf32, #tpu.memory_space<vmem>>, vector<128x128xf32>
      tpu.vector_store %arg6[%c0_13, %c0_14], %20 {strides = array<i32>} : memref<128x128xf32, #tpu.memory_space<vmem>>, vector<128x128xf32>,
    } else {
    }
    return
  }
  func.func @transform_0(%arg0: i32, %arg1: i32, %arg2: i32) -> (i32, i32) {
    %c0_i32 = arith.constant 0 : i32
    return %arg0, %arg2 : i32, i32
  }
  func.func @transform_1(%arg0: i32, %arg1: i32, %arg2: i32) -> (i32, i32) {
    %c0_i32 = arith.constant 0 : i32
    %c0_i32_0 = arith.constant 0 : i32
    return %c0_i32, %arg1 : i32, i32
  }
  func.func @transform_2(%arg0: i32, %arg1: i32, %arg2: i32) -> (i32, i32) {
    %c0_i32 = arith.constant 0 : i32
    %c0_i32_0 = arith.constant 0 : i32
    return %c0_i32, %arg1 : i32, i32
  }
  func.func @transform_3(%arg0: i32, %arg1: i32, %arg2: i32) -> (i32, i32) {
    %c0_i32 = arith.constant 0 : i32
    return %arg0, %arg1 : i32, i32
  }
}

</mosaic_0001>

<bundles_post_ra>
// kernel: tpu_custom_call.1
= control target key start
LH: loop header
LB: loop body
LE: loop exit
PB: predicated region body
PF: predicated region fallthrough
CT: control target
= control target key end

     0   :  { %s1532_s0 = inlined_call_operand.hbm [shape: bf16[256,512], index: 0, kind: input, shape index: {}]   ;;  %s1533_s1 = inlined_call_operand.hbm [shape: bf16[512,128], index: 1, kind: input, shape index: {}]   ;;  %s1534_s2 = inlined_call_operand.vmem [shape: f32[1,128], index: 2, kind: input, shape index: {}]   ;;  %s1535_s3 = inlined_call_operand.hbm [shape: f32[256,128], index: 3, kind: output, shape index: {}]  }
   0x1   :  { %1549 = sst [smem:[#allocation17_spill]] %s1533_s1 }
   0x2   :  { %8 = vsyncpa [#allocation4], 0 }
   0x3   :  { %10 = vsyncpa [#allocation4 + $0x1], 0 }
   0x4   :  { %11 = vsyncpa [#allocation7], 0 }
   0x5   :  { %12 = vsyncpa [#allocation5], 0 }
   0x6   :  { %14 = vsyncpa [#allocation5 + $0x1], 0  ;;  %s1214_s12 = smov 0   ;;  %s1216_s13 = smov 0  }
   0x7   :  { %s1218_s14 = smov 0   ;;  %s1220_s15 = smov 0  }
   0x8   :  { %s1222_s16 = smov 0   ;;  %s1224_s17 = smov 0  }
   0x9   :  { %s1226_s18 = smov 0   ;;  %s1228_s19 = smov 0  }
   0xa   :  { %s1230_s20 = smov 0   ;;  %s1232_s21 = smov 0  }
   0xb   :  { %s1234_s22 = smov 0  }
   0xc LB: > { %1550 = sst [smem:[#allocation12_spill]] %s1143_s12  ;;  %s758_s23 = sadd.s32 4294967295, %s1183_s22   ;;  %s1183_s22 = sphi %s1234_s22, %s20_s22   ;;  %s1179_s21 = sphi %s1232_s21, %s1586_s21   ;;  %s1175_s20 = sphi %s1230_s20, %s1577_s20   ;;  %s1171_s19 = sphi %s1228_s19, %s1585_s19   ;;  %s1167_s18 = sphi %s1226_s18, %s1576_s18   ;;  %s1163_s17 = sphi %s1224_s17, %s1584_s17   ;;  %s1159_s16 = sphi %s1222_s16, %s1583_s16   ;;  %s1155_s15 = sphi %s1220_s15, %s1582_s15   ;;  %s1151_s14 = sphi %s1218_s14, %s1581_s14   ;;  %s1147_s13 = sphi %s1216_s13, %s1580_s13   ;;  %s1143_s12 = sphi %s1214_s12, %s1579_s12  }
   0xd   : > { %1551 = sst [smem:[#allocation13_spill]] %s1175_s20  ;;  %s759_s24 = sadd.s32 4294967294, %s1183_s22  }
   0xe   : > { %p55_p0 = scmp.ne.s32.totalorder %s1163_s17, %s1159_s16  ;;  %p56_p1 = scmp.eq.s32.totalorder %s1183_s22, 0 }
   0xf   : > { %p61_p2 = scmp.ne.s32.totalorder %s1159_s16, %s1155_s15  ;;  %p1274_p3 = scmp.eq.s32.totalorder %s758_s23, 0 }
  0x10   : > { %p1279_p4 = por %p56_p1, %p55_p0  ;;  %p138_p5 = scmp.ne.s32.totalorder %s1151_s14, %s1147_s13 }
  0x11   : > { %s1552_s26 = scalar_select %p1274_p3, 1, 0 }
  0x12   : > { %p1287_p6 = por %p1274_p3, %p61_p2  ;;  %p139_p7 = scmp.eq.s32.totalorder %s758_s23, 7 }
  0x13   : > { %p144_p8 = scmp.ne.s32.totalorder %s1147_s13, %s1143_s12  ;;  %p145_p9 = scmp.eq.s32.totalorder %s759_s24, 7 }
  0x14   : > { %s1554_s29 = scalar_select %p1287_p6, 1, 0 }
  0x15   : > { %p1293_p10 = por %p139_p7, %p138_p5  ;;  %p760_p11 = scmp.ge.s32.totalorder %s1183_s22, 1 }
  0x16   : > { %p1298_p12 = por %p145_p9, %p144_p8  ;;  %p152_p13 = scmp.lt.s32.totalorder %s1183_s22, 9 }
  0x17   : > { %s1555_s30 = scalar_select %p1293_p10, 1, 0 }
  0x18   : > { %s1556_s4 = scalar_select %p1298_p12, 1, 0 }
  0x19   : > { %p1303_p0 = pnand %p760_p11, %p152_p13  ;;  %s1185_s6 = smov [#allocation6]  }
  0x1a   : > { %1557 = sst [smem:[#allocation14_spill]] %s1556_s4  ;;  %s166_s7 = sshll.u32 %s1185_s6, 4  ;;  %s167_s7 = int_to_ptr.vmem [resolvable:$true] %s166_s7 }
  0x1b   : > { %s1558_s5 = scalar_select %p1303_p0, 1, 0 }
  0x1c   : > { %p872_p1 = pneg %p1303_p0  ;;  %p885_p2 = scmp.lt.s32.totalorder %s1183_s22, 8 }
  0x1d   : > { %s1561_s1 = sld [smem:[#allocation17_spill]] }
  0x1e   : > { %p1312_p5 = pnand %p872_p1, %p1274_p3  ;;  %p1318_p7 = pnand %p885_p2, %p1279_p4 }
  0x20   : > { %s1560_s9 = scalar_select %p1318_p7, 1, 0 }
  0x21   : > { %p1001_p9 = pneg %p1312_p5 }
  0x23   : > { %s999_s15 = scalar_lea.hbm %s1561_s1, 4096 }
  0x24   : > { %p1000_p8 = scmp.ne.s32.totalorder %s1561_s1, %s999_s15  ;;  %p1006_p1 = scmp.lt.u32.totalorder %s999_s15, %s1561_s1 }
  0x26   : > { %p1002_p11 = pnand %p1001_p9, %p1000_p8 }
  0x28   : > { %p1003_p13 = pneg %p1002_p11 }
  0x2a   : > { %p1008_p4 = pnand %p1006_p1, %p1003_p13 }
  0x2c   : > { %1011 = shalt.err (!%p1008_p4)
}
  0x2d   : > { %s1012_s28 = scalar_lea.vmem %s167_s7, 4096  ;;  %p1020_p3 = scmp.lt.s32.totalorder %s167_s7, %s167_s7 }
  0x2e   : > { %p1013_p2 = scmp.ne.s32.totalorder %s167_s7, %s1012_s28  ;;  %p1021_p6 = scmp.lt.s32.totalorder %s1012_s28, %s1012_s28 }
  0x30   : > { %p1015_p12 = pnand %p1013_p2, %p1001_p9  ;;  %p1022_p0 = por %p1021_p6, %p1020_p3 }
  0x32   : > { %p1016_p10 = pneg %p1015_p12 }
  0x34   : > { %p1023_p7 = pnand %p1022_p0, %p1016_p10 }
  0x36   : > { %1026 = shalt.err (!%p1023_p7)
}
  0x37   : > { %s1543_s10 = smov 64   ;;  %s1544_s25 = smov 4  }
  0x38   : > { %875 = dma.hbm_to_vmem [thread:$0]  (!%p1312_p5), %s1561_s1, 4096, %s167_s7, [#allocation7], %s1543_s10, %s1543_s10, %s1544_s25  }
  0x39   : > { %s32_s23 = sadd.s32 1, %s1175_s20  ;;  %s39_s24 = sadd.s32 1, %s1179_s21 }
  0x3a   : > { %p33_p3 = scmp.ge.s32.totalorder %s32_s23, 4  ;;  %s186_s6 = sand.u32 1, %s1163_s17  }
  0x3b   : > { %s764_s28 = sshll.u32 %s186_s6, 6  ;;  %s798_s27 = sshll.u32 %s1179_s21, 6 }
  0x3c   : > { %s1588_s23 = smov (%p33_p3, %s32_s23), 0  ;;  %s1590_s24 = smov (!%p33_p3, %s39_s24), %s1179_s21 }
  0x3d   : > { %1562 = sst [smem:[#allocation15_spill]] %s1588_s23  ;;  %s44_s8 = ssub.s32 %s1175_s20, %s1588_s23 }
  0x3e   : > { %p41_p6 = scmp.ge.s32.totalorder %s1590_s24, 2  ;;  %s196_s4 = sadd.s32 %s1175_s20, %s798_s27 }
  0x3f   : > { %s190_s7 = scalar_lea.vmem [#allocation3], %s764_s28  ;;  %s767_s15 = sshll.u32 %s196_s4, 6 }
  0x40   : > { %s199_s11 = sshll.u32 %s190_s7, 4  ;;  %s1592_s24 = smov (%p41_p6, %s1590_s24), 0  ;;  %s1353_s11 = int_to_ptr.vmem [resolvable:$true] %s199_s11 }
  0x41   : > { %1563 = sst [smem:[#allocation16_spill]] %s1592_s24  ;;  %s43_s10 = ssub.s32 %s1179_s21, %s1592_s24 }
  0x42   : > { %s1360_s12 = scalar_lea.hbm %s1532_s0, %s767_s15  ;;  %s45_s27 = sor.u32 %s44_s8, %s43_s10 }
  0x43   : > { %p126_p10 = scmp.eq.s32.totalorder %s43_s10, 0  ;;  %p46_p12 = scmp.eq.s32.totalorder %s45_s27, 0 }
  0x44   : > { %s1564_s28 = sadd.s32 1, %s1151_s14  ;;  %s1565_s23 = sadd.s32 1, %s1163_s17 }
  0x45   : > { %s1365_s7 = scalar_select %p126_p10, %s1151_s14, %s1564_s28  }
  0x46   : > { %s1370_s4 = scalar_select %p46_p12, %s1163_s17, %s1565_s23  }
  0x47   : > { %s1372_s20 = scalar_lea.sflag [#allocation4], %s186_s6  ;;  %s1027_s24 = scalar_lea.hbm %s1360_s12, 1024 }
  0x48   : > { %p1028_p0 = scmp.ne.s32.totalorder %s1360_s12, %s1027_s24  ;;  %p1566_p5 = scmp.ne.s32.totalorder %s1560_s9, 0 }
  0x49   : > { %s1032_s10 = scalar_lea.hbm %s1532_s0, 8192  ;;  %p1033_p11 = scmp.lt.u32.totalorder %s1360_s12, %s1532_s0 }
  0x4a   : > { %p1029_p7 = pneg %p1566_p5  ;;  %p1034_p13 = scmp.lt.u32.totalorder %s1032_s10, %s1027_s24 }
  0x4b   : > { %p1036_p4 = scmp.lt.u32.totalorder %s1027_s24, %s1360_s12 }
  0x4c   : > { %p1030_p8 = pnand %p1029_p7, %p1028_p0  ;;  %p1035_p1 = por %p1034_p13, %p1033_p11 }
  0x4e   : > { %p1031_p9 = pneg %p1030_p8  ;;  %p1037_p2 = por %p1036_p4, %p1035_p1 }
  0x50   : > { %p1038_p3 = pnand %p1037_p2, %p1031_p9 }
  0x52   : > { %1041 = shalt.err (!%p1038_p3)
}
  0x53   : > { %s1042_s23 = scalar_lea.vmem %s1353_s11, 1024  ;;  %s1188_s6 = smov [#allocation3]  }
  0x54   : > { %p1043_p6 = scmp.ne.s32.totalorder %s1353_s11, %s1042_s23  ;;  %s1047_s27 = sshll.u32 %s1188_s6, 4  ;;  %s1048_s27 = int_to_ptr.vmem [resolvable:$false] %s1047_s27 }
  0x55   : > { %s1049_s28 = scalar_lea.vmem %s1048_s27, 2048  ;;  %p1050_p0 = scmp.lt.s32.totalorder %s1353_s11, %s1048_s27 }
  0x56   : > { %p1045_p10 = pnand %p1043_p6, %p1029_p7  ;;  %p1051_p8 = scmp.lt.s32.totalorder %s1049_s28, %s1042_s23 }
  0x58   : > { %p1046_p12 = pneg %p1045_p10  ;;  %p1052_p11 = por %p1051_p8, %p1050_p0 }
  0x5a   : > { %p1053_p13 = pnand %p1052_p11, %p1046_p12 }
  0x5c   : > { %1056 = shalt.err (!%p1053_p13)
}
  0x5d   : > { %s1189_s24 = smov 256   ;;  %s1567_s1 = smov 4  }
  0x5e   : > { %s1568_s25 = smov 64   ;;  %p1569_p7 = scmp.ne.s32.totalorder %s1558_s5, 0 }
  0x5f   : > { %879 = dma.hbm_to_vmem [thread:$0]  (!%p1566_p5), %s1360_s12, 1024, %s1353_s11, %s1372_s20, %s1189_s24, %s1568_s25, %s1567_s1  }
  0x60   : > { %211 = sbr.rel (%p1569_p7) target bundleno = 419 (0x1a3), region = 32  ;;  %s213_s10 = sand.u32 (!%p1569_p7), 1, %s1159_s16  }
  0x61   : > { %s769_s8 = sshll.u32 (!%p1569_p7), %s213_s10, 6  ;;  %s214_s15 = scalar_lea.sflag (!%p1569_p7), [#allocation4], %s213_s10 }
  0x62   : > { %s1405_s23 = scalar_lea.vmem (!%p1569_p7), [#allocation3], %s769_s8  ;;  %p1570_p9 = scmp.ne.s32.totalorder (!%p1569_p7), %s1554_s29, 0 }
  0x67   : > { %1130 = dma.done.wait (%p1570_p9), %s214_s15, 1024  }
  0x68   : > { %1132 = vsyncadd (%p1570_p9), %s214_s15, 4294966272  ;;  %p1571_p1 = scmp.ne.s32.totalorder %s1552_s26, 0 }
  0x6a   : > { %1134 = dma.done.wait (%p1571_p1), [#allocation7], 4096  }
  0x6b   : > { %1136 = vsyncadd (%p1571_p1), [#allocation7], 4294963200  ;;  %s244_s12 = sand.u32 1, %s1147_s13   ;;  %p772_p5 = scmp.ne.s32.totalorder %s1167_s18, 0 }
  0x6c   : > { %s771_s20 = sshll.u32 %s244_s12, 7  ;;  %v1190_v0 = vmov (!%p772_p5), 0.0  }
  0x6d   : > { %s1418_s5 = scalar_lea.vmem [#allocation8], %s771_s20  ;;  %256 = sbr.rel (%p772_p5) target bundleno = 117 (0x75), region = 44  ;;  %257 = vst [vmem:[#allocation2] sm:$0xff] (!%p772_p5), %v1190_v0  ;;  %258 = vst [vmem:[#allocation2 + $0x8] sm:$0xff] (!%p772_p5), %v1190_v0 }
  0x6e   : > { %259 = vst [vmem:[#allocation2 + $0x10] sm:$0xff] (!%p772_p5), %v1190_v0  ;;  %260 = vst [vmem:[#allocation2 + $0x18] sm:$0xff] (!%p772_p5), %v1190_v0 }
  0x6f   : > { %261 = vst [vmem:[#allocation2 + $0x20] sm:$0xff] (!%p772_p5), %v1190_v0  ;;  %262 = vst [vmem:[#allocation2 + $0x28] sm:$0xff] (!%p772_p5), %v1190_v0 }
  0x70   : > { %263 = vst [vmem:[#allocation2 + $0x30] sm:$0xff] (!%p772_p5), %v1190_v0  ;;  %264 = vst [vmem:[#allocation2 + $0x38] sm:$0xff] (!%p772_p5), %v1190_v0 }
  0x71   : > { %265 = vst [vmem:[#allocation2 + $0x40] sm:$0xff] (!%p772_p5), %v1190_v0  ;;  %266 = vst [vmem:[#allocation2 + $0x48] sm:$0xff] (!%p772_p5), %v1190_v0 }
  0x72   : > { %267 = vst [vmem:[#allocation2 + $0x50] sm:$0xff] (!%p772_p5), %v1190_v0  ;;  %268 = vst [vmem:[#allocation2 + $0x58] sm:$0xff] (!%p772_p5), %v1190_v0 }
  0x73   : > { %269 = vst [vmem:[#allocation2 + $0x60] sm:$0xff] (!%p772_p5), %v1190_v0  ;;  %270 = vst [vmem:[#allocation2 + $0x68] sm:$0xff] (!%p772_p5), %v1190_v0 }
  0x74   : > { %271 = vst [vmem:[#allocation2 + $0x70] sm:$0xff] %v1190_v0  ;;  %272 = vst [vmem:[#allocation2 + $0x78] sm:$0xff] %v1190_v0 }
  0x75 PF: > { %s773_s26 = sshll.u32 %s1167_s18, 7  ;;  %v991_v1 = vld [vmem:[%s1405_s23] sm:$0xff]   ;;  %v993_v11 = vld [vmem:[%s1405_s23 + $0x8] sm:$0xff]   ;;  %v995_v13 = vld [vmem:[%s1405_s23 + $0x10] sm:$0xff]   ;;  %p791_p4 = scmp.ne.s32.totalorder %s1167_s18, 3 }
  0x76   : > { %s274_s29 = sshra.s32 %s773_s26, 3  ;;  %v992_v2 = vld [vmem:[%s1405_s23 + $0x20] sm:$0xff]   ;;  %832 = vmatprep.mubr.bf16.mxu0 %v991_v1  ;;  %v994_v12 = vld [vmem:[%s1405_s23 + $0x28] sm:$0xff]   ;;  %v996_v14 = vld [vmem:[%s1405_s23 + $0x30] sm:$0xff]  }
  0x77   : > { %s774_s9 = sshll.u32 %s274_s29, 2  ;;  %840 = vmatprep.mubr.bf16.mxu1 %v992_v2  ;;  %v997_v15 = vld [vmem:[%s1405_s23 + $0x18] sm:$0xff]   ;;  %v296_v17 = vld [vmem:[#allocation2 + $0x10] sm:$0xff]  ;;  %v294_v19 = vld [vmem:[#allocation2] sm:$0xff] }
  0x78   : > { %s1424_s11 = scalar_lea.vmem [#allocation6], %s774_s9  ;;  %v998_v16 = vld [vmem:[%s1405_s23 + $0x38] sm:$0xff]   ;;  %v295_v29 = vld [vmem:[#allocation2 + $0x8] sm:$0xff]  ;;  %v300_v41 = vld [vmem:[#allocation2 + $0x30] sm:$0xff] }
  0x79   : > { %v983_v3 = vld [vmem:[%s1424_s11] sm:$0xff]   ;;  %v984_v4 = vld [vmem:[%s1424_s11 + $0x8] sm:$0xff]   ;;  %v985_v5 = vld [vmem:[%s1424_s11 + $0x10] sm:$0xff]  }
  0x7a   : > { %816 = vmatprep.subr.bf16.mxu0 %v983_v3  ;;  %848 = vmatprep.subr.bf16.mxu1 %v983_v3  ;;  %v986_v6 = vld [vmem:[%s1424_s11 + $0x18] sm:$0xff]   ;;  %v987_v7 = vld [vmem:[%s1424_s11 + $0x20] sm:$0xff]   ;;  %v988_v8 = vld [vmem:[%s1424_s11 + $0x28] sm:$0xff]  }
  0x7b   : > { %817 = vmatpush3.bf16.msra.mxu0 %v983_v3  ;;  %856 = vmatpush3.bf16.msra.mxu1 %v983_v3  ;;  %v989_v9 = vld [vmem:[%s1424_s11 + $0x30] sm:$0xff]   ;;  %v990_v10 = vld [vmem:[%s1424_s11 + $0x38] sm:$0xff]   ;;  %v302_v20 = vld [vmem:[#allocation2 + $0x40] sm:$0xff] }
  0x7c   : > { %818 = vmatprep.subr.bf16.mxu0 %v984_v4  ;;  %849 = vmatprep.subr.bf16.mxu1 %v984_v4  ;;  %v304_v18 = vld [vmem:[#allocation2 + $0x50] sm:$0xff]  ;;  %v297_v23 = vld [vmem:[#allocation2 + $0x18] sm:$0xff]  ;;  %v303_v30 = vld [vmem:[#allocation2 + $0x48] sm:$0xff] }
  0x7d   : > { %v305_v24 = vld [vmem:[#allocation2 + $0x58] sm:$0xff]  ;;  %v308_v42 = vld [vmem:[#allocation2 + $0x70] sm:$0xff]  ;;  %v298_v43 = vld [vmem:[#allocation2 + $0x20] sm:$0xff] }
  0x7e   : > { %v306_v44 = vld [vmem:[#allocation2 + $0x60] sm:$0xff]  ;;  %v301_v47 = vld [vmem:[#allocation2 + $0x38] sm:$0xff]  ;;  %v299_v53 = vld [vmem:[#allocation2 + $0x28] sm:$0xff] }
  0x7f   : > { %819 = vmatpush3.bf16.msra.mxu0 %v984_v4  ;;  %857 = vmatpush3.bf16.msra.mxu1 %v984_v4  ;;  %v309_v48 = vld [vmem:[#allocation2 + $0x78] sm:$0xff]  ;;  %v307_v54 = vld [vmem:[#allocation2 + $0x68] sm:$0xff]  ;;  %v792_v2 = vld [vmem:[%s1534_s2] ss:$0 sm:$0xff] (!%p791_p4) }
  0x80   : > { %820 = vmatprep.subr.bf16.mxu0 %v985_v5  ;;  %850 = vmatprep.subr.bf16.mxu1 %v985_v5 }
  0x83   : > { %821 = vmatpush3.bf16.msra.mxu0 %v985_v5  ;;  %858 = vmatpush3.bf16.msra.mxu1 %v985_v5 }
  0x84   : > { %822 = vmatprep.subr.bf16.mxu0 %v986_v6  ;;  %851 = vmatprep.subr.bf16.mxu1 %v986_v6 }
  0x87   : > { %823 = vmatpush3.bf16.msra.mxu0 %v986_v6  ;;  %859 = vmatpush3.bf16.msra.mxu1 %v986_v6 }
  0x88   : > { %824 = vmatprep.subr.bf16.mxu0 %v987_v7  ;;  %852 = vmatprep.subr.bf16.mxu1 %v987_v7 }
  0x8b   : > { %825 = vmatpush3.bf16.msra.mxu0 %v987_v7  ;;  %860 = vmatpush3.bf16.msra.mxu1 %v987_v7 }
  0x8c   : > { %826 = vmatprep.subr.bf16.mxu0 %v988_v8  ;;  %853 = vmatprep.subr.bf16.mxu1 %v988_v8 }
  0x8f   : > { %827 = vmatpush3.bf16.msra.mxu0 %v988_v8  ;;  %861 = vmatpush3.bf16.msra.mxu1 %v988_v8 }
  0x90   : > { %828 = vmatprep.subr.bf16.mxu0 %v989_v9  ;;  %854 = vmatprep.subr.bf16.mxu1 %v989_v9 }
  0x93   : > { %829 = vmatpush3.bf16.msra.mxu0 %v989_v9  ;;  %862 = vmatpush3.bf16.msra.mxu1 %v989_v9 }
  0x94   : > { %830 = vmatprep.subr.bf16.mxu0 %v990_v10  ;;  %855 = vmatprep.subr.bf16.mxu1 %v990_v10 }
  0x97   : > { %831 = vmatpush3.bf16.msra.mxu0 %v990_v10  ;;  %863 = vmatpush3.bf16.msra.mxu1 %v990_v10 }
  0x9a   : > { %833 = vmatmul.mubr.bf16.vlgmr.msra.gmra.mrb[0].mxu0 %v993_v11  ;;  %841 = vmatmul.mubr.bf16.vlgmr.msra.gmra.mrb[0].mxu1 %v994_v12 }
  0x9b   : > { %836 = vmatprep.mubr.bf16.mxu0 %v995_v13  ;;  %844 = vmatprep.mubr.bf16.mxu1 %v996_v14 }
  0xa2   : > { %837 = vmatmul.mubr.bf16.gmra.mrb[4].mxu0 %v997_v15  ;;  %845 = vmatmul.mubr.bf16.gmra.mrb[4].mxu1 %v998_v16 }
 0x16d   : > { %v834_v21 = vpop.f32.mrb[0].mxu0  ;;  %v842_v22 = vpop.f32.mrb[0].mxu1 }
 0x16e   : > { %v521_v25 = vadd.f32 %v834_v21, %v296_v17  ;;  %v529_v26 = vadd.f32 %v842_v22, %v304_v18  ;;  %v456_v27 = vpop.f32.mrb[1].mxu0  ;;  %v488_v28 = vpop.f32.mrb[1].mxu1 }
 0x16f   : > { %v519_v31 = vadd.f32 %v456_v27, %v294_v19  ;;  %v527_v32 = vadd.f32 %v488_v28, %v302_v20  ;;  %v835_v33 = vpop.f32.mrb[2].mxu0  ;;  %v843_v34 = vpop.f32.mrb[2].mxu1 }
 0x170   : > { %537 = vst [vmem:[#allocation2 + $0x10] sm:$0xff] %v521_v25  ;;  %545 = vst [vmem:[#allocation2 + $0x50] sm:$0xff] %v529_v26  ;;  %v522_v35 = vadd.f32 %v835_v33, %v297_v23  ;;  %v530_v36 = vadd.f32 %v843_v34, %v305_v24  ;;  %v459_v37 = vpop.f32.mrb[3].mxu0  ;;  %v491_v38 = vpop.f32.mrb[3].mxu1 }
 0x171   : > { %535 = vst [vmem:[#allocation2] sm:$0xff] %v519_v31  ;;  %543 = vst [vmem:[#allocation2 + $0x40] sm:$0xff] %v527_v32  ;;  %v520_v39 = vadd.f32 %v459_v37, %v295_v29  ;;  %v528_v40 = vadd.f32 %v491_v38, %v303_v30 }
 0x172   : > { %538 = vst [vmem:[#allocation2 + $0x18] sm:$0xff] %v522_v35  ;;  %546 = vst [vmem:[#allocation2 + $0x58] sm:$0xff] %v530_v36 }
 0x173   : > { %536 = vst [vmem:[#allocation2 + $0x8] sm:$0xff] %v520_v39  ;;  %544 = vst [vmem:[#allocation2 + $0x48] sm:$0xff] %v528_v40 }
 0x175   : > { %v838_v45 = vpop.f32.mrb[4].mxu0  ;;  %v846_v46 = vpop.f32.mrb[4].mxu1  ;;  %554 = sbr.rel (%p791_p4) target bundleno = 393 (0x189), region = 48 }
 0x176   : > { %v525_v49 = vadd.f32 %v838_v45, %v300_v41  ;;  %v533_v50 = vadd.f32 %v846_v46, %v308_v42  ;;  %v472_v51 = vpop.f32.mrb[5].mxu0  ;;  %v504_v52 = vpop.f32.mrb[5].mxu1 }
 0x177   : > { %v523_v55 = vadd.f32 %v472_v51, %v298_v43  ;;  %v531_v56 = vadd.f32 %v504_v52, %v306_v44  ;;  %v839_v57 = vpop.f32.mrb[6].mxu0  ;;  %v847_v58 = vpop.f32.mrb[6].mxu1  ;;  %v557_v6 = vld [vmem:[#allocation2 + $0x10] sm:$0xff] (!%p791_p4) }
 0x178   : > { %541 = vst [vmem:[#allocation2 + $0x30] sm:$0xff] %v525_v49  ;;  %549 = vst [vmem:[#allocation2 + $0x70] sm:$0xff] %v533_v50  ;;  %v526_v59 = vadd.f32 %v839_v57, %v301_v47  ;;  %v534_v60 = vadd.f32 %v847_v58, %v309_v48  ;;  %v475_v61 = vpop.f32.mrb[7].mxu0  ;;  %v507_v62 = vpop.f32.mrb[7].mxu1  ;;  %v555_v1 = vld [vmem:[#allocation2] sm:$0xff] (!%p791_p4)  ;;  %v580_v9 = vadd.f32 (!%p791_p4), %v792_v2, %v557_v6  ;;  %v565_v21 = vld [vmem:[#allocation2 + $0x50] sm:$0xff] (!%p791_p4) }
 0x179   : > { %539 = vst [vmem:[#allocation2 + $0x20] sm:$0xff] %v523_v55  ;;  %547 = vst [vmem:[#allocation2 + $0x60] sm:$0xff] %v531_v56  ;;  %v524_v63 = vadd.f32 %v475_v61, %v299_v53  ;;  %v532_v0 = vadd.f32 %v507_v62, %v307_v54  ;;  %v578_v4 = vadd.f32 (!%p791_p4), %v792_v2, %v555_v1  ;;  %v558_v7 = vld [vmem:[#allocation2 + $0x18] sm:$0xff] (!%p791_p4)  ;;  %v563_v19 = vld [vmem:[#allocation2 + $0x40] sm:$0xff] (!%p791_p4) }
 0x17a   : > { %542 = vst [vmem:[#allocation2 + $0x38] sm:$0xff] %v526_v59  ;;  %550 = vst [vmem:[#allocation2 + $0x78] sm:$0xff] %v534_v60  ;;  %v556_v3 = vld [vmem:[#allocation2 + $0x8] sm:$0xff] (!%p791_p4)  ;;  %v581_v10 = vadd.f32 (!%p791_p4), %v792_v2, %v558_v7  ;;  %v596_v22 = vmax.f32 (!%p791_p4), %v580_v9, 0.0  ;;  %v566_v26 = vld [vmem:[#allocation2 + $0x58] sm:$0xff] (!%p791_p4)  ;;  %v586_v31 = vadd.f32 (!%p791_p4), %v792_v2, %v563_v19  ;;  %v588_v36 = vadd.f32 (!%p791_p4), %v792_v2, %v565_v21 }
 0x17b   : > { %540 = vst [vmem:[#allocation2 + $0x28] sm:$0xff] %v524_v63  ;;  %548 = vst [vmem:[#allocation2 + $0x68] sm:$0xff] %v532_v0  ;;  %v579_v5 = vadd.f32 (!%p791_p4), %v792_v2, %v556_v3  ;;  %v594_v15 = vmax.f32 (!%p791_p4), %v578_v4, 0.0  ;;  %v564_v20 = vld [vmem:[#allocation2 + $0x48] sm:$0xff] (!%p791_p4)  ;;  %v589_v37 = vadd.f32 (!%p791_p4), %v792_v2, %v566_v26 }
 0x17c   : > { %v597_v23 = vmax.f32 %v581_v10, 0.0  ;;  %v587_v32 = vadd.f32 %v792_v2, %v564_v20  ;;  %612 = vst [vmem:[%s1418_s5 + $0x10] sm:$0xff] %v596_v22  ;;  %v602_v39 = vmax.f32 %v586_v31, 0.0  ;;  %v604_v43 = vmax.f32 %v588_v36, 0.0 }
 0x17d   : > { %v595_v16 = vmax.f32 %v579_v5, 0.0  ;;  %610 = vst [vmem:[%s1418_s5] sm:$0xff] %v594_v15  ;;  %v605_v44 = vmax.f32 %v589_v37, 0.0 }
 0x17e   : > { %613 = vst [vmem:[%s1418_s5 + $0x18] sm:$0xff] %v597_v23  ;;  %v603_v40 = vmax.f32 %v587_v32, 0.0  ;;  %618 = vst [vmem:[%s1418_s5 + $0x40] sm:$0xff] %v602_v39 }
 0x17f   : > { %v561_v13 = vld [vmem:[#allocation2 + $0x30] sm:$0xff]  ;;  %611 = vst [vmem:[%s1418_s5 + $0x8] sm:$0xff] %v595_v16  ;;  %620 = vst [vmem:[%s1418_s5 + $0x50] sm:$0xff] %v604_v43 }
 0x180   : > { %v559_v8 = vld [vmem:[#allocation2 + $0x20] sm:$0xff]  ;;  %v584_v18 = vadd.f32 %v792_v2, %v561_v13  ;;  %v569_v33 = vld [vmem:[#allocation2 + $0x70] sm:$0xff]  ;;  %619 = vst [vmem:[%s1418_s5 + $0x48] sm:$0xff] %v603_v40  ;;  %621 = vst [vmem:[%s1418_s5 + $0x58] sm:$0xff] %v605_v44 }
 0x181   : > { %v582_v11 = vadd.f32 %v792_v2, %v559_v8  ;;  %v562_v14 = vld [vmem:[#allocation2 + $0x38] sm:$0xff]  ;;  %v567_v27 = vld [vmem:[#allocation2 + $0x60] sm:$0xff]  ;;  %v592_v42 = vadd.f32 %v792_v2, %v569_v33 }
 0x182   : > { %v560_v12 = vld [vmem:[#allocation2 + $0x28] sm:$0xff]  ;;  %v585_v25 = vadd.f32 %v792_v2, %v562_v14  ;;  %v600_v30 = vmax.f32 %v584_v18, 0.0  ;;  %v570_v34 = vld [vmem:[#allocation2 + $0x78] sm:$0xff]  ;;  %v590_v38 = vadd.f32 %v792_v2, %v567_v27 }
 0x183   : > { %v583_v17 = vadd.f32 %v792_v2, %v560_v12  ;;  %v598_v24 = vmax.f32 %v582_v11, 0.0  ;;  %v568_v28 = vld [vmem:[#allocation2 + $0x68] sm:$0xff]  ;;  %v593_v46 = vadd.f32 %v792_v2, %v570_v34  ;;  %v608_v48 = vmax.f32 %v592_v42, 0.0 }
 0x184   : > { %v601_v35 = vmax.f32 %v585_v25, 0.0  ;;  %616 = vst [vmem:[%s1418_s5 + $0x30] sm:$0xff] %v600_v30  ;;  %v591_v41 = vadd.f32 %v792_v2, %v568_v28  ;;  %v606_v45 = vmax.f32 %v590_v38, 0.0 }
 0x185   : > { %v599_v29 = vmax.f32 %v583_v17, 0.0  ;;  %614 = vst [vmem:[%s1418_s5 + $0x20] sm:$0xff] %v598_v24  ;;  %v609_v49 = vmax.f32 %v593_v46, 0.0  ;;  %624 = vst [vmem:[%s1418_s5 + $0x70] sm:$0xff] %v608_v48 }
 0x186   : > { %617 = vst [vmem:[%s1418_s5 + $0x38] sm:$0xff] %v601_v35  ;;  %v607_v47 = vmax.f32 %v591_v41, 0.0  ;;  %622 = vst [vmem:[%s1418_s5 + $0x60] sm:$0xff] %v606_v45 }
 0x187   : > { %615 = vst [vmem:[%s1418_s5 + $0x28] sm:$0xff] %v599_v29  ;;  %625 = vst [vmem:[%s1418_s5 + $0x78] sm:$0xff] %v609_v49 }
 0x188   : > { %623 = vst [vmem:[%s1418_s5 + $0x68] sm:$0xff] %v607_v47 }
 0x189 PF: > { %s799_s18 = sshll.u32 %s1171_s19, 11  ;;  %s641_s25 = sshll.u32 %s1418_s5, 4  ;;  %s1467_s25 = int_to_ptr.vmem [resolvable:$true] %s641_s25 }
 0x18a   : > { %s1464_s1 = scalar_lea.hbm %s1535_s3, %s799_s18  ;;  %s1471_s10 = scalar_lea.sflag [#allocation5], %s244_s12 }
 0x18b   : > { %s1057_s8 = scalar_lea.vmem %s1467_s25, 2048  ;;  %p1572_p3 = scmp.ne.s32.totalorder %s1555_s30, 0 }
 0x18c   : > { %p1058_p2 = scmp.ne.s32.totalorder %s1467_s25, %s1057_s8  ;;  %s1191_s19 = smov [#allocation8]  }
 0x18d   : > { %s1061_s15 = sshll.u32 %s1191_s19, 4  ;;  %s1062_s15 = int_to_ptr.vmem [resolvable:$false] %s1061_s15 }
 0x18e   : > { %p1059_p6 = pnand %p1058_p2, %p1572_p3  ;;  %s1063_s23 = scalar_lea.vmem %s1062_s15, 4096 }
 0x18f   : > { %p1064_p12 = scmp.lt.s32.totalorder %s1467_s25, %s1062_s15  ;;  %p1065_p0 = scmp.lt.s32.totalorder %s1063_s23, %s1057_s8 }
 0x190   : > { %p1060_p10 = pneg %p1059_p6 }
 0x191   : > { %p1066_p8 = por %p1065_p0, %p1064_p12 }
 0x193   : > { %p1067_p11 = pnand %p1066_p8, %p1060_p10 }
 0x195   : > { %1070 = shalt.err (!%p1067_p11)
}
 0x196   : > { %s1071_s12 = scalar_lea.hbm %s1464_s1, 2048  ;;  %s1075_s26 = scalar_lea.hbm %s1535_s3, 4096 }
 0x197   : > { %p1072_p13 = scmp.ne.s32.totalorder %s1464_s1, %s1071_s12  ;;  %p1076_p1 = scmp.lt.u32.totalorder %s1464_s1, %s1535_s3 }
 0x198   : > { %p1077_p5 = scmp.lt.u32.totalorder %s1075_s26, %s1071_s12  ;;  %p1079_p2 = scmp.lt.u32.totalorder %s1071_s12, %s1464_s1 }
 0x199   : > { %p1073_p7 = pnand %p1072_p13, %p1572_p3 }
 0x19a   : > { %p1078_p4 = por %p1077_p5, %p1076_p1 }
 0x19b   : > { %p1074_p9 = pneg %p1073_p7 }
 0x19c   : > { %p1080_p6 = por %p1079_p2, %p1078_p4 }
 0x19e   : > { %p1081_p10 = pnand %p1080_p6, %p1074_p9 }
 0x1a0   : > { %1084 = shalt.err (!%p1081_p10)
}
 0x1a1   : > { %s1192_s11 = smov 128   ;;  %s1193_s6 = smov 8  }
 0x1a2   : > { %870 = dma.vmem_to_hbm [thread:$0]  (%p1572_p3), %s1467_s25, 2048, %s1464_s1, %s1471_s10, %s1192_s11, %s1192_s11, %s1193_s6  }
 0x1a3 PF: > { %s1573_s27 = sld [smem:[#allocation12_spill]]  ;;  %s1574_s18 = sld [smem:[#allocation14_spill]] }
 0x1a4   : > { %p887_p12 = scmp.ge.s32.totalorder %s1183_s22, 2 }
 0x1a9   : > { %s656_s28 = sand.u32 1, %s1573_s27   ;;  %p1575_p0 = scmp.ne.s32.totalorder %s1574_s18, 0 }
 0x1aa   : > { %s657_s24 = scalar_lea.sflag [#allocation5], %s656_s28 }
 0x1ab   : > { %p881_p8 = pnand %p887_p12, %p1575_p0 }
 0x1ad   : > { %1138 = dma.done.wait (!%p881_p8), %s657_s24, 2048  }
 0x1ae   : > { %1140 = vsyncadd (!%p881_p8), %s657_s24, 4294965248  ;;  %s20_s22 = sadd.s32 1, %s1183_s22   ;;  %s1576_s18 = sld [smem:[#allocation13_spill]] }
 0x1af   : > { %p17_p11 = scmp.ge.s32.totalorder %s20_s22, 10   ;;  %s1577_s20 = sld [smem:[#allocation15_spill]] }
 0x1b0   : > { %s1578_s30 = sld [smem:[#allocation16_spill]]  ;;  %s1579_s12 = smov %s1147_s13 }
 0x1b1   : > { %s1580_s13 = smov %s1151_s14  ;;  %s1581_s14 = smov %s1365_s7 }
 0x1b2   : > { %s1582_s15 = smov %s1159_s16  ;;  %s1583_s16 = smov %s1163_s17 }
 0x1b3   : > { %s1584_s17 = smov %s1370_s4  ;;  %s1585_s19 = smov %s1179_s21 }
 0x1b4   :  { %19 = sbr.rel (!%p17_p11) target bundleno = 12 (0xc), region = 94 }
 0x1b6   : > { %s1586_s21 = smov %s1578_s30 }
 0x1bb   :  { %662 = vsyncpa [#allocation4], 1 }
 0x1bc   :  { %664 = vsyncpa [#allocation4 + $0x1], 1 }
 0x1bd   :  { %665 = vsyncpa [#allocation7], 1 }
 0x1be   :  { %666 = vsyncpa [#allocation5], 1 }
 0x1bf   :  { %668 = vsyncpa [#allocation5 + $0x1], 1 }

</bundles_post_ra>
